<compile_context>
chip_gen: v5e
topology: v5e:2x2
jax: 0.10.0
libtpu: 0.0.40
codegen_flags: <defaults>
</compile_context>

<pallas_src>
import functools

import jax
import jax.numpy as jnp
from jax.experimental import pallas as pl
from jax.experimental.pallas import tpu as pltpu


def _round_up(n, m):
    return ((n + m - 1) // m) * m


def poly_net_kernel(x_ref, w1_ref, b1_ref, w2_ref, b2_ref, o_ref):
    # log(x) in f32 (EUP transcendental; keep f32 for v5e which has no bf16 EUP).
    logx = jnp.log(x_ref[...].astype(jnp.float32))
    # First linear: log(x) @ W1 + b1  (MXU, f32 accumulation).
    h = jnp.dot(logx.astype(w1_ref.dtype), w1_ref[...],
                preferred_element_type=jnp.float32)
    h = h + b1_ref[...].astype(jnp.float32)
    # Monomial layer.
    m = jnp.exp(h)
    # Second linear: m @ W2 + b2.
    y = jnp.dot(m.astype(w2_ref.dtype), w2_ref[...],
                preferred_element_type=jnp.float32)
    y = y + b2_ref[...].astype(jnp.float32)
    o_ref[...] = y.astype(o_ref.dtype)


@functools.partial(jax.jit, static_argnames=("block_b",))
def poly_net_forward(x, w1, b1, w2, b2, *, block_b=1024):
    """x: (B, input_dim); w1: (input_dim, mon_dim); b1: (1, mon_dim);
       w2: (mon_dim, out_dim); b2: (1, out_dim). Returns (B, out_dim) in x.dtype."""
    B, input_dim = x.shape
    mon_dim = w1.shape[1]
    out_dim = w2.shape[1]
    out_dtype = x.dtype

    LANE = 128
    mon_p = _round_up(mon_dim, LANE)
    out_p = _round_up(out_dim, LANE)

    # Batch tile: large enough to amortize per-step overhead, 8-aligned, never
    # larger than the (8-aligned) batch itself.
    TB = min(block_b, _round_up(B, 8))
    Bp = _round_up(B, TB)

    # --- wrapper-side padding (all contributions provably zero / sliced off) ---
    xp = x
    if Bp != B:
        # Pad rows with 1.0 so log() stays finite in the (discarded) padded rows.
        xp = jnp.concatenate([x, jnp.ones((Bp - B, input_dim), x.dtype)], axis=0)
    w1p = jnp.pad(w1, ((0, 0), (0, mon_p - mon_dim))) if mon_p != mon_dim else w1
    b1p = jnp.pad(b1, ((0, 0), (0, mon_p - mon_dim))) if mon_p != mon_dim else b1
    if mon_p != mon_dim or out_p != out_dim:
        # Padded W2 ROWS are zero, so exp(0)=1 from padded mon columns contributes 0.
        w2p = jnp.pad(w2, ((0, mon_p - mon_dim), (0, out_p - out_dim)))
    else:
        w2p = w2
    b2p = jnp.pad(b2, ((0, 0), (0, out_p - out_dim))) if out_p != out_dim else b2

    grid = (pl.cdiv(Bp, TB),)

    cost = pl.CostEstimate(
        flops=2 * Bp * (input_dim * mon_p + mon_p * out_p),
        transcendentals=Bp * (input_dim + mon_p),
        bytes_accessed=int(
            xp.size * xp.dtype.itemsize
            + w1p.size * w1p.dtype.itemsize
            + b1p.size * b1p.dtype.itemsize
            + w2p.size * w2p.dtype.itemsize
            + b2p.size * b2p.dtype.itemsize
            + Bp * out_p * jnp.dtype(out_dtype).itemsize
        ),
    )

    y = pl.pallas_call(
        poly_net_kernel,
        out_shape=jax.ShapeDtypeStruct((Bp, out_p), out_dtype),
        grid=grid,
        in_specs=[
            # Batch-tiled activation: pipelined tile i.
            pl.BlockSpec((TB, input_dim), lambda i: (i, 0)),
            # Weights / biases: constant block index -> resident in VMEM across steps.
            pl.BlockSpec((input_dim, mon_p), lambda i: (0, 0)),
            pl.BlockSpec((1, mon_p), lambda i: (0, 0)),
            pl.BlockSpec((mon_p, out_p), lambda i: (0, 0)),
            pl.BlockSpec((1, out_p), lambda i: (0, 0)),
        ],
        out_specs=pl.BlockSpec((TB, out_p), lambda i: (i, 0)),
        compiler_params=pltpu.CompilerParams(
            dimension_semantics=("parallel",),
        ),
        cost_estimate=cost,
    )(xp, w1p, b1p, w2p, b2p)

    # Strip batch / lane padding.
    return y[:B, :out_dim]


def init_params(key, input_dim, mon_dim, out_dim, b1=True, b2=True):
    """Deterministic synthetic init matching PyTorch shapes/init style.
    Weights are stored pre-transposed: W1 (input_dim, mon_dim), W2 (mon_dim, out_dim)."""
    k1, k2, k3, k4 = jax.random.split(key, 4)
    # lin_hidden.weight ~ U(0, 2/input_dim)  (matches .uniform_(0, 2/input_dim))
    w1 = jax.random.uniform(k1, (input_dim, mon_dim), jnp.float32,
                            minval=0.0, maxval=2.0 / input_dim)
    bound1 = 1.0 / (input_dim ** 0.5)
    bias1 = (jax.random.uniform(k2, (1, mon_dim), jnp.float32, -bound1, bound1)
             if b1 else jnp.zeros((1, mon_dim), jnp.float32))
    bound2 = 1.0 / (mon_dim ** 0.5)
    w2 = jax.random.uniform(k3, (mon_dim, out_dim), jnp.float32, -bound2, bound2)
    bias2 = (jax.random.uniform(k4, (1, out_dim), jnp.float32, -bound2, bound2)
             if b2 else jnp.zeros((1, out_dim), jnp.float32))
    return w1, bias1, w2, bias2


if __name__ == "__main__":
    key = jax.random.PRNGKey(0)
    batch, input_dim, mon_dim, out_dim = 8, 32, 64, 16

    kx, kp = jax.random.split(key)
    # x must be strictly positive (log(x) in the forward pass).
    x = jax.random.uniform(kx, (batch, input_dim), jnp.float32,
                           minval=0.1, maxval=1.1)
    w1, b1, w2, b2 = init_params(kp, input_dim, mon_dim, out_dim, b1=True, b2=True)

    # Small case (single grid step).
    y = jax.block_until_ready(poly_net_forward(x, w1, b1, w2, b2))
    y_ref = jnp.exp(jnp.log(x) @ w1 + b1) @ w2 + b2
    assert y.shape == (batch, out_dim)
    assert jnp.allclose(y, y_ref, atol=1e-4, rtol=1e-4)

    # Larger, non-multiple batch: exercises the multi-tile grid + batch/lane padding.
    B2 = 200
    x2 = jax.random.uniform(jax.random.fold_in(kx, 1), (B2, input_dim),
                            jnp.float32, minval=0.1, maxval=1.1)
    y2 = jax.block_until_ready(poly_net_forward(x2, w1, b1, w2, b2, block_b=64))
    y2_ref = jnp.exp(jnp.log(x2) @ w1 + b1) @ w2 + b2
    assert y2.shape == (B2, out_dim)
    assert jnp.allclose(y2, y2_ref, atol=1e-4, rtol=1e-4)

    print("KERNEL_OK")
</pallas_src>

<mosaic_0001>
module attributes {stable_mosaic.version = 11 : i64} {
  func.func @poly_net_kernel(%arg0: i32, %arg1: memref<8x32xf32, #tpu.memory_space<vmem>>, %arg2: memref<32x128xf32, #tpu.memory_space<vmem>>, %arg3: memref<1x128xf32, #tpu.memory_space<vmem>>, %arg4: memref<128x128xf32, #tpu.memory_space<vmem>>, %arg5: memref<1x128xf32, #tpu.memory_space<vmem>>, %arg6: memref<8x128xf32, #tpu.memory_space<vmem>>) attributes {dimension_semantics = [#tpu.dimension_semantics<parallel>], iteration_bounds = array<i64: 1>, scalar_prefetch = 0 : i64, scratch_operands = 0 : i64, tpu.core_type = #tpu.core_type<tc>, window_params = [{transform_indices = @transform_0, window_bounds = array<i64: 8, 32>}, {pipeline_mode = #tpu.pipeline_mode<synchronous>, transform_indices = @transform_1, window_bounds = array<i64: 32, 128>}, {pipeline_mode = #tpu.pipeline_mode<synchronous>, transform_indices = @transform_2, window_bounds = array<i64: 1, 128>}, {pipeline_mode = #tpu.pipeline_mode<synchronous>, transform_indices = @transform_3, window_bounds = array<i64: 128, 128>}, {pipeline_mode = #tpu.pipeline_mode<synchronous>, transform_indices = @transform_4, window_bounds = array<i64: 1, 128>}, {transform_indices = @transform_5, window_bounds = array<i64: 8, 128>}]} {
    %c0 = arith.constant 0 : index
    %c0_0 = arith.constant 0 : index
    %0 = vector.load %arg1[%c0, %c0_0] : memref<8x32xf32, #tpu.memory_space<vmem>>, vector<8x32xf32>
    %1 = math.log %0 : vector<8x32xf32>
    %c0_1 = arith.constant 0 : index
    %c0_2 = arith.constant 0 : index
    %2 = vector.load %arg2[%c0_1, %c0_2] : memref<32x128xf32, #tpu.memory_space<vmem>>, vector<32x128xf32>
    %cst = arith.constant dense<0.000000e+00> : vector<8x128xf32>
    %3 = tpu.matmul %1, %2, %cst {dimension_numbers = #tpu.dot_dimension_numbers<[1], [0], [0], [1], [0, 0, 1, 1], [], []>} : vector<8x32xf32>, vector<32x128xf32>, vector<8x128xf32> -> vector<8x128xf32>
    %c0_3 = arith.constant 0 : index
    %c0_4 = arith.constant 0 : index
    %4 = vector.load %arg3[%c0_3, %c0_4] : memref<1x128xf32, #tpu.memory_space<vmem>>, vector<1x128xf32>
    %5 = vector.broadcast %4 : vector<1x128xf32> to vector<8x128xf32>
    %6 = arith.addf %3, %5 : vector<8x128xf32>
    %7 = math.exp %6 : vector<8x128xf32>
    %c0_5 = arith.constant 0 : index
    %c0_6 = arith.constant 0 : index
    %8 = vector.load %arg4[%c0_5, %c0_6] : memref<128x128xf32, #tpu.memory_space<vmem>>, vector<128x128xf32>
    %cst_7 = arith.constant dense<0.000000e+00> : vector<8x128xf32>
    %9 = tpu.matmul %7, %8, %cst_7 {dimension_numbers = #tpu.dot_dimension_numbers<[1], [0], [0], [1], [0, 0, 1, 1], [], []>} : vector<8x128xf32>, vector<128x128xf32>, vector<8x128xf32> -> vector<8x128xf32>
    %c0_8 = arith.constant 0 : index
    %c0_9 = arith.constant 0 : index
    %10 = vector.load %arg5[%c0_8, %c0_9] : memref<1x128xf32, #tpu.memory_space<vmem>>, vector<1x128xf32>
    %11 = vector.broadcast %10 : vector<1x128xf32> to vector<8x128xf32>
    %12 = arith.addf %9, %11 : vector<8x128xf32>
    %c0_10 = arith.constant 0 : index
    %c0_11 = arith.constant 0 : index
    %13 = vector.load %arg6[%c0_10, %c0_11] : memref<8x128xf32, #tpu.memory_space<vmem>>, vector<8x128xf32>
    tpu.vector_store %arg6[%c0_10, %c0_11], %12 {strides = array<i32>} : memref<8x128xf32, #tpu.memory_space<vmem>>, vector<8x128xf32>,
    return
  }
  func.func @transform_0(%arg0: i32) -> (i32, i32) {
    %c0_i32 = arith.constant 0 : i32
    %c0_i32_0 = arith.constant 0 : i32
    return %arg0, %c0_i32 : i32, i32
  }
  func.func @transform_1(%arg0: i32) -> (i32, i32) {
    %c0_i32 = arith.constant 0 : i32
    %c0_i32_0 = arith.constant 0 : i32
    %c0_i32_1 = arith.constant 0 : i32
    return %c0_i32, %c0_i32_0 : i32, i32
  }
  func.func @transform_2(%arg0: i32) -> (i32, i32) {
    %c0_i32 = arith.constant 0 : i32
    %c0_i32_0 = arith.constant 0 : i32
    %c0_i32_1 = arith.constant 0 : i32
    return %c0_i32, %c0_i32_0 : i32, i32
  }
  func.func @transform_3(%arg0: i32) -> (i32, i32) {
    %c0_i32 = arith.constant 0 : i32
    %c0_i32_0 = arith.constant 0 : i32
    %c0_i32_1 = arith.constant 0 : i32
    return %c0_i32, %c0_i32_0 : i32, i32
  }
  func.func @transform_4(%arg0: i32) -> (i32, i32) {
    %c0_i32 = arith.constant 0 : i32
    %c0_i32_0 = arith.constant 0 : i32
    %c0_i32_1 = arith.constant 0 : i32
    return %c0_i32, %c0_i32_0 : i32, i32
  }
  func.func @transform_5(%arg0: i32) -> (i32, i32) {
    %c0_i32 = arith.constant 0 : i32
    %c0_i32_0 = arith.constant 0 : i32
    return %arg0, %c0_i32 : i32, i32
  }
}

</mosaic_0001>

<bundles_post_ra>
// kernel: poly_net_forward.1
= control target key start
LH: loop header
LB: loop body
LE: loop exit
PB: predicated region body
PF: predicated region fallthrough
CT: control target
= control target key end

     0   :  { %s252_s0 = inlined_call_operand.vmem [shape: f32[8,32], index: 0, kind: input, shape index: {}]   ;;  %s253_s1 = inlined_call_operand.vmem [shape: f32[32,128], index: 1, kind: input, shape index: {}]   ;;  %s254_s2 = inlined_call_operand.vmem [shape: f32[1,128], index: 2, kind: input, shape index: {}]   ;;  %s255_s3 = inlined_call_operand.vmem [shape: f32[128,128], index: 3, kind: input, shape index: {}]   ;;  %s256_s4 = inlined_call_operand.vmem [shape: f32[1,128], index: 4, kind: input, shape index: {}]   ;;  %s257_s5 = inlined_call_operand.hbm [shape: f32[8,128], index: 5, kind: output, shape index: {}]  }
   0x1   :  { %v27_v0 = vld [vmem:[%s253_s1 + $0x18] sm:$0xff]  ;;  %v26_v1 = vld [vmem:[%s253_s1 + $0x10] sm:$0xff]  ;;  %v21_v2 = vld [vmem:[%s252_s0] sm:$0xff] }
   0x2   :  { %48 = vmatpush.msra.mxu0 %v27_v0  ;;  %v73_v3 = vld [vmem:[%s255_s3 + $0x78] sm:$0xff]  ;;  %v25_v4 = vld [vmem:[%s253_s1 + $0x8] sm:$0xff]  ;;  %119 = vlog2.f32 %v21_v2  ;;  %v72_v5 = vld [vmem:[%s255_s3 + $0x70] sm:$0xff] }
   0x3   :  { %78 = vmatpush.msra.mxu1 %v73_v3  ;;  %v71_v6 = vld [vmem:[%s255_s3 + $0x68] sm:$0xff]  ;;  %v24_v7 = vld [vmem:[%s253_s1] sm:$0xff] }
   0x4   :  { %49 = vmatpush.msra.mxu0 %v26_v1  ;;  %v70_v8 = vld [vmem:[%s255_s3 + $0x60] sm:$0xff] }
   0x5   :  { %79 = vmatpush.msra.mxu1 %v72_v5 }
   0x6   :  { %50 = vmatpush.msra.mxu0 %v25_v4 }
   0x7   :  { %80 = vmatpush.msra.mxu1 %v71_v6 }
   0x8   :  { %10 = vsyncpa [#allocation3], 0  ;;  %51 = vmatpush.msra.mxu0 %v24_v7  ;;  %v69_v9 = vld [vmem:[%s255_s3 + $0x58] sm:$0xff]  ;;  %v120_v10 = vpop.eup %119  ;;  %vm32_vm0 = vcmask 261120   ;;  %v68_v12 = vld [vmem:[%s255_s3 + $0x50] sm:$0xff]  ;;  %s149_s11 = smov [#allocation2]  }
   0x9   :  { %81 = vmatpush.msra.mxu1 %v70_v8  ;;  %v23_v11 = vmul.f32 0.6931472, %v120_v10  ;;  %v67_v13 = vld [vmem:[%s255_s3 + $0x48] sm:$0xff]  ;;  %v66_v14 = vld [vmem:[%s255_s3 + $0x40] sm:$0xff]  ;;  %v65_v15 = vld [vmem:[%s255_s3 + $0x38] sm:$0xff]  ;;  %s104_s12 = sshll.u32 %s149_s11, 4  ;;  %s105_s12 = int_to_ptr.vmem [resolvable:$true] %s104_s12 }
   0xa   :  { %v64_v16 = vld [vmem:[%s255_s3 + $0x30] sm:$0xff]  ;;  %v63_v17 = vld [vmem:[%s255_s3 + $0x28] sm:$0xff]  ;;  %v62_v18 = vld [vmem:[%s255_s3 + $0x20] sm:$0xff]  ;;  %s106_s1 = sshll.u32 %s257_s5, 4  ;;  %s107_s1 = int_to_ptr.hbm [resolvable:$true] %s106_s1 }
   0xb   :  { %82 = vmatpush.msra.mxu1 %v69_v9  ;;  %115 = vmatmul.msk.f32.vlgmr.msra.gmra.mxu0 %vm32_vm0, %v23_v11  ;;  %v61_v19 = vld [vmem:[%s255_s3 + $0x18] sm:$0xff]  ;;  %v60_v20 = vld [vmem:[%s255_s3 + $0x10] sm:$0xff]  ;;  %v59_v21 = vld [vmem:[%s255_s3 + $0x8] sm:$0xff] }
   0xc   :  { %v58_v22 = vld [vmem:[%s255_s3] sm:$0xff] }
   0xd   :  { %83 = vmatpush.msra.mxu1 %v68_v12  ;;  %v117_v23 = vld [vmem:[%s254_s2] ss:$0 sm:$0xff] }
   0xe   :  { %v118_v28 = vld [vmem:[%s256_s4] ss:$0 sm:$0xff] }
   0xf   :  { %84 = vmatpush.msra.mxu1 %v67_v13 }
  0x11   :  { %85 = vmatpush.msra.mxu1 %v66_v14 }
  0x13   :  { %86 = vmatpush.msra.mxu1 %v65_v15 }
  0x15   :  { %87 = vmatpush.msra.mxu1 %v64_v16 }
  0x17   :  { %88 = vmatpush.msra.mxu1 %v63_v17 }
  0x19   :  { %89 = vmatpush.msra.mxu1 %v62_v18 }
  0x1b   :  { %90 = vmatpush.msra.mxu1 %v61_v19 }
  0x1d   :  { %91 = vmatpush.msra.mxu1 %v60_v20 }
  0x1f   :  { %92 = vmatpush.msra.mxu1 %v59_v21 }
  0x21   :  { %93 = vmatpush.msra.mxu1 %v58_v22 }
  0x88   :  { %v53_v24 = vpop.f32.mrf.mxu0 }
  0x89   :  { %v54_v25 = vadd.f32 %v117_v23, %v53_v24 }
  0x8b   :  { %v56_v26 = vmul.f32 1.442695, %v54_v25 }
  0x8d   :  { %121 = vpow2.f32 %v56_v26 }
  0x93   :  { %v122_v27 = vpop.eup %121 }
  0x94   :  { %94 = vmatmul.f32.vlgmr.msra.gmra.mxu1 %v122_v27 }
 0x111   :  { %v95_v29 = vpop.f32.mrf.mxu1 }
 0x112   :  { %v96_v30 = vadd.f32 %v118_v28, %v95_v29 }
 0x114   :  { %98 = vst [vmem:[#allocation2] sm:$0xff] %v96_v30 }
 0x115   :  { %109 = dma.vmem_to_hbm [thread:$0]  %s105_s12, 128, %s107_s1, [#allocation3]  }
 0x116   :  { %147 = dma.done.wait [#allocation3], 128  }
 0x117   :  { %148 = vsyncadd [#allocation3], 4294967168 }
 0x118   :  { %114 = vsyncpa [#allocation3], 1 }

</bundles_post_ra>
